<compile_context>
chip_gen: v7x
topology: tpu7x:2x2x1
jax: 0.10.0
libtpu: 0.0.40
codegen_flags: <defaults>
</compile_context>

<pallas_src>
import functools

import jax
import jax.numpy as jnp
import numpy as np
from jax.experimental import pallas as pl
from jax.experimental.pallas import tpu as pltpu

WINDOW = 204      # samples per analysis window
HOP = 51          # hop between windows
STRIDE = 4        # encoder conv kernel/stride
FRAMES = WINDOW // STRIDE   # 51 hidden frames / watermark samples per window


def _round_up(n, m):
    return (n + m - 1) // m * m


# --------------------------------------------------------------------------
# Kernel 1: fused encoder (bf16 MXU matmul + f32 tanh) + decoder (bf16 MXU
# matmul + f32 tanh).  Layout: features/hidden on sublanes, rows = (window,
# frame) on lanes; batch is a squeezed grid axis.
# --------------------------------------------------------------------------
def _fused_watermark_kernel(patch_ref, w_enc_ref, b_enc_ref, w_dec_ref,
                            b_dec_ref, out_ref):
    # patch_ref : (K, TILE_R)      K = 4*C_in input features
    # w_enc_ref : (H, K)           b_enc_ref : (H, 1)
    # w_dec_ref : (C_out, H)       b_dec_ref : (C_out, 1)
    # out_ref   : (C_out, TILE_R)
    patch = patch_ref[...].astype(jnp.bfloat16)                   # (K, TILE_R)
    w_enc = w_enc_ref[...].astype(jnp.bfloat16)

    # Encoder: (H, K) @ (K, TILE_R) on the MXU, single-pass bf16, f32 acc.
    hidden = jnp.dot(w_enc, patch, preferred_element_type=jnp.float32)
    hidden = jnp.tanh(hidden + b_enc_ref[...])                    # f32 (H, TILE_R)

    # Decoder: second (tiny-M) MXU matmul; MXU is otherwise idle here.
    w_dec = w_dec_ref[...].astype(jnp.bfloat16)
    wm = jnp.dot(w_dec, hidden.astype(jnp.bfloat16),
                 preferred_element_type=jnp.float32)              # (C_out, TILE_R)
    wm = jnp.tanh(wm + b_dec_ref[...])
    out_ref[...] = wm.astype(out_ref.dtype)


# --------------------------------------------------------------------------
# Kernel 2: (+1e-9) + mask + add-back, lane/sublane-dense over a flat slab,
# both outputs alias their inputs.
# --------------------------------------------------------------------------
def _apply_watermark_kernel(x_ref, awm_ref, y_ref, wm_out_ref, *, alpha):
    x = x_ref[...]
    mask = (x != 0.0).astype(x.dtype)
    wm = (awm_ref[...] + 1e-9) * mask + 1e-7       # pad_w_zeros eps folded in
    scaled = alpha * wm
    y_ref[...] = x + scaled
    wm_out_ref[...] = scaled


# --------------------------------------------------------------------------
# Forward wrapper (window extraction, pallas_calls, padding arithmetic).
# --------------------------------------------------------------------------
@functools.partial(
    jax.jit,
    static_argnames=("future_ts", "future", "alpha", "tile_rows", "lane_width"))
def watermark_forward(x, w_enc, b_enc, w_dec, b_dec, *, future_ts=50,
                      future=True, alpha=1.0, tile_rows=2048, lane_width=512):
    B, C, T = x.shape
    H, K = w_enc.shape
    C_out = w_dec.shape[0]
    assert K == STRIDE * C and C_out == C

    nw = int((T - (WINDOW + future_ts)) // HOP)
    if nw <= 0:
        return None                       # matches the PyTorch module

    # ---- window extraction without a gather: 4 hop-shifted slices + concat.
    # window w = hops [w, w+1, w+2, w+3]  (204 = 4 * 51), needs 51*(nw+3) <= T.
    xh = x[:, :, :HOP * (nw + 3)].reshape(B, C, nw + 3, HOP)
    windows = jnp.concatenate([xh[:, :, j:j + nw, :] for j in range(4)],
                              axis=-1)                              # (B,C,nw,204)
    frames = windows.reshape(B, C, nw, FRAMES, STRIDE)
    # feature index k = c*4 + tap on sublanes, rows (w, f) on lanes, batch-major
    patches = jnp.transpose(frames, (0, 1, 4, 2, 3)).reshape(B, K, nw * FRAMES)

    rows_b = nw * FRAMES
    rows_b128 = _round_up(rows_b, 128)
    tile = _round_up(min(tile_rows, rows_b128), 128)
    if B == 1:
        # keep >= 2 grid steps for v7x's two TensorCores when rows allow it
        while tile >= 256 and _round_up(rows_b, tile) // tile < 2:
            tile = _round_up(tile // 2, 128)
    rows_b_pad = _round_up(rows_b, tile)
    if rows_b_pad != rows_b:
        patches = jnp.pad(patches, ((0, 0), (0, 0), (0, rows_b_pad - rows_b)))

    # ---- fused encoder + decoder over all windows; output already in
    #      (B, C_out, rows) layout (no post-kernel transpose).
    wm_flat = pl.pallas_call(
        _fused_watermark_kernel,
        out_shape=jax.ShapeDtypeStruct((B, C_out, rows_b_pad), x.dtype),
        grid_spec=pltpu.PrefetchScalarGridSpec(
            num_scalar_prefetch=0,
            grid=(B, rows_b_pad // tile),
            in_specs=[
                pl.BlockSpec((None, K, tile), lambda b, i: (b, 0, i)),
                pl.BlockSpec((H, K), lambda b, i: (0, 0)),      # resident weights
                pl.BlockSpec((H, 1), lambda b, i: (0, 0)),
                pl.BlockSpec((C_out, H), lambda b, i: (0, 0)),
                pl.BlockSpec((C_out, 1), lambda b, i: (0, 0)),
            ],
            out_specs=pl.BlockSpec((None, C_out, tile), lambda b, i: (b, 0, i)),
        ),
        compiler_params=pltpu.CompilerParams(
            dimension_semantics=("parallel", "parallel"),
            vmem_limit_bytes=32 * 1024 * 1024,
        ),
    )(patches, w_enc, b_enc, w_dec, b_dec)

    wm = wm_flat[:, :, :rows_b]                      # (B, C_out, nw*51)

    # ---- pad_w_zeros (WITHOUT the +1e-9, which is folded into kernel 2) -----
    prefix = (WINDOW + int(future_ts)) if future else WINDOW
    suffix = T - rows_b - prefix
    actual_wm = jnp.pad(wm, ((0, 0), (0, 0), (prefix, suffix)))   # (B, C, T)

    # ---- mask + add-back on a flat (rows, lane_width) slab ------------------
    total = B * C * T
    rows2 = _round_up(max(-(-total // lane_width), 8), 8)
    flat_len = rows2 * lane_width
    extra = flat_len - total
    x_flat = x.reshape(-1)
    awm_flat = actual_wm.reshape(-1)
    if extra:
        x_flat = jnp.pad(x_flat, (0, extra))
        awm_flat = jnp.pad(awm_flat, (0, extra))
    x2 = x_flat.reshape(rows2, lane_width)
    awm2 = awm_flat.reshape(rows2, lane_width)

    row_tile = rows2
    for cand in (512, 256, 128, 64, 32, 16, 8):
        if cand <= rows2 and rows2 % cand == 0 and rows2 // cand >= 2:
            row_tile = cand
            break

    y2, wm2 = pl.pallas_call(
        functools.partial(_apply_watermark_kernel, alpha=float(alpha)),
        out_shape=(
            jax.ShapeDtypeStruct((rows2, lane_width), x.dtype),
            jax.ShapeDtypeStruct((rows2, lane_width), x.dtype),
        ),
        grid_spec=pltpu.PrefetchScalarGridSpec(
            num_scalar_prefetch=0,
            grid=(rows2 // row_tile,),
            in_specs=[
                pl.BlockSpec((row_tile, lane_width), lambda i: (i, 0)),
                pl.BlockSpec((row_tile, lane_width), lambda i: (i, 0)),
            ],
            out_specs=(
                pl.BlockSpec((row_tile, lane_width), lambda i: (i, 0)),
                pl.BlockSpec((row_tile, lane_width), lambda i: (i, 0)),
            ),
        ),
        compiler_params=pltpu.CompilerParams(
            dimension_semantics=("parallel",),
            vmem_limit_bytes=32 * 1024 * 1024,
        ),
        input_output_aliases={0: 0, 1: 1},   # reuse x / padded-watermark buffers
    )(x2, awm2)

    if extra:
        y = y2.reshape(-1)[:total].reshape(B, C, T)
        wm_scaled = wm2.reshape(-1)[:total].reshape(B, C, T)
    else:
        y = y2.reshape(B, C, T)
        wm_scaled = wm2.reshape(B, C, T)
    return y, wm_scaled


# --------------------------------------------------------------------------
# Pure-JAX reference (mirrors the per-window PyTorch forward) for validation.
# --------------------------------------------------------------------------
def watermark_forward_reference(x, w_enc, b_enc, w_dec, b_dec, *, future_ts=50,
                                future=True, alpha=1.0):
    B, C, T = x.shape
    nw = int((T - (WINDOW + future_ts)) // HOP)
    if nw <= 0:
        return None
    chunks = []
    for i in range(nw):
        win = x[:, :, i * HOP:i * HOP + WINDOW]                  # (B, C, 204)
        fr = win.reshape(B, C, FRAMES, STRIDE)
        feat = jnp.transpose(fr, (0, 2, 1, 3)).reshape(B, FRAMES, C * STRIDE)
        hidden = jnp.tanh(jnp.einsum('bfk,hk->bfh', feat, w_enc) + b_enc[:, 0])
        wm = jnp.tanh(jnp.einsum('bfh,ch->bfc', hidden, w_dec) + b_dec[:, 0])
        chunks.append(jnp.transpose(wm, (0, 2, 1)))              # (B, C, 51)
    watermark = jnp.concatenate(chunks, axis=-1)
    prefix = (WINDOW + int(future_ts)) if future else WINDOW
    suffix = T - watermark.shape[-1] - prefix
    actual = jnp.pad(watermark, ((0, 0), (0, 0), (prefix, suffix))) + 1e-9
    mask = (x != 0).astype(x.dtype)
    wm_m = actual * mask + 1e-7
    return x + alpha * wm_m, alpha * wm_m


if __name__ == "__main__":
    key = jax.random.PRNGKey(0)
    B, C, T = 2, 2, 1024
    H = 32
    FUTURE_TS = 50
    ALPHA = 1.0
    K = STRIDE * C

    k1, k2, k3, k4, k5 = jax.random.split(key, 5)
    x = jax.random.normal(k1, (B, C, T), dtype=jnp.float32)
    w_enc = 0.35 * jax.random.normal(k2, (H, K), dtype=jnp.float32)
    b_enc = 0.10 * jax.random.normal(k3, (H, 1), dtype=jnp.float32)
    w_dec = 0.20 * jax.random.normal(k4, (C, H), dtype=jnp.float32)
    b_dec = 0.10 * jax.random.normal(k5, (C, 1), dtype=jnp.float32)

    out = watermark_forward(x, w_enc, b_enc, w_dec, b_dec,
                            future_ts=FUTURE_TS, future=True, alpha=ALPHA)
    assert out is not None
    y, wm = jax.block_until_ready(out)

    y_ref, wm_ref = watermark_forward_reference(
        x, w_enc, b_enc, w_dec, b_dec,
        future_ts=FUTURE_TS, future=True, alpha=ALPHA)
    # Tolerance covers the deliberate bf16 MXU operand rounding in-kernel.
    np.testing.assert_allclose(np.asarray(y), np.asarray(y_ref),
                               atol=3e-2, rtol=3e-2)
    np.testing.assert_allclose(np.asarray(wm), np.asarray(wm_ref),
                               atol=3e-2, rtol=3e-2)
    print("KERNEL_OK")
</pallas_src>

<mosaic_0001>
module attributes {stable_mosaic.version = 11 : i64} {
  func.func @_apply_watermark_kernel(%arg0: i32, %arg1: memref<8x512xf32, #tpu.memory_space<vmem>>, %arg2: memref<8x512xf32, #tpu.memory_space<vmem>>, %arg3: memref<8x512xf32, #tpu.memory_space<vmem>>, %arg4: memref<8x512xf32, #tpu.memory_space<vmem>>) attributes {dimension_semantics = [#tpu.dimension_semantics<parallel>], iteration_bounds = array<i64: 1>, scalar_prefetch = 0 : i64, scratch_operands = 0 : i64, tpu.core_type = #tpu.core_type<tc>, window_params = [{transform_indices = @transform_0, window_bounds = array<i64: 8, 512>}, {transform_indices = @transform_1, window_bounds = array<i64: 8, 512>}, {transform_indices = @transform_2, window_bounds = array<i64: 8, 512>}, {transform_indices = @transform_3, window_bounds = array<i64: 8, 512>}]} {
    %c0 = arith.constant 0 : index
    %c0_0 = arith.constant 0 : index
    %0 = vector.load %arg1[%c0, %c0_0] : memref<8x512xf32, #tpu.memory_space<vmem>>, vector<8x512xf32>
    %cst = arith.constant 0.000000e+00 : f32
    %1 = vector.broadcast %cst : f32 to vector<8x512xf32>
    %2 = arith.cmpf one, %0, %1 : vector<8x512xf32>
    %3 = arith.extui %2 : vector<8x512xi1> to vector<8x512xi32>
    %4 = arith.sitofp %3 : vector<8x512xi32> to vector<8x512xf32>
    %c0_1 = arith.constant 0 : index
    %c0_2 = arith.constant 0 : index
    %5 = vector.load %arg2[%c0_1, %c0_2] : memref<8x512xf32, #tpu.memory_space<vmem>>, vector<8x512xf32>
    %cst_3 = arith.constant 9.99999971E-10 : f32
    %6 = vector.broadcast %cst_3 : f32 to vector<8x512xf32>
    %7 = arith.addf %5, %6 : vector<8x512xf32>
    %8 = arith.mulf %7, %4 : vector<8x512xf32>
    %cst_4 = arith.constant 1.000000e-07 : f32
    %9 = vector.broadcast %cst_4 : f32 to vector<8x512xf32>
    %10 = arith.addf %8, %9 : vector<8x512xf32>
    %cst_5 = arith.constant 1.000000e+00 : f32
    %11 = vector.broadcast %cst_5 : f32 to vector<8x512xf32>
    %12 = arith.mulf %11, %10 : vector<8x512xf32>
    %13 = arith.addf %0, %12 : vector<8x512xf32>
    %c0_6 = arith.constant 0 : index
    %c0_7 = arith.constant 0 : index
    %14 = vector.load %arg3[%c0_6, %c0_7] : memref<8x512xf32, #tpu.memory_space<vmem>>, vector<8x512xf32>
    tpu.vector_store %arg3[%c0_6, %c0_7], %13 {strides = array<i32>} : memref<8x512xf32, #tpu.memory_space<vmem>>, vector<8x512xf32>,
    %c0_8 = arith.constant 0 : index
    %c0_9 = arith.constant 0 : index
    %15 = vector.load %arg4[%c0_8, %c0_9] : memref<8x512xf32, #tpu.memory_space<vmem>>, vector<8x512xf32>
    tpu.vector_store %arg4[%c0_8, %c0_9], %12 {strides = array<i32>} : memref<8x512xf32, #tpu.memory_space<vmem>>, vector<8x512xf32>,
    return
  }
  func.func @transform_0(%arg0: i32) -> (i32, i32) {
    %c0_i32 = arith.constant 0 : i32
    %c0_i32_0 = arith.constant 0 : i32
    return %arg0, %c0_i32 : i32, i32
  }
  func.func @transform_1(%arg0: i32) -> (i32, i32) {
    %c0_i32 = arith.constant 0 : i32
    %c0_i32_0 = arith.constant 0 : i32
    return %arg0, %c0_i32 : i32, i32
  }
  func.func @transform_2(%arg0: i32) -> (i32, i32) {
    %c0_i32 = arith.constant 0 : i32
    %c0_i32_0 = arith.constant 0 : i32
    return %arg0, %c0_i32 : i32, i32
  }
  func.func @transform_3(%arg0: i32) -> (i32, i32) {
    %c0_i32 = arith.constant 0 : i32
    %c0_i32_0 = arith.constant 0 : i32
    return %arg0, %c0_i32 : i32, i32
  }
}

module attributes {stable_mosaic.version = 11 : i64} {
  func.func @_fused_watermark_kernel(%arg0: i32, %arg1: i32, %arg2: memref<1x8x768xf32, #tpu.memory_space<vmem>>, %arg3: memref<32x8xf32, #tpu.memory_space<vmem>>, %arg4: memref<32x1xf32, #tpu.memory_space<vmem>>, %arg5: memref<2x32xf32, #tpu.memory_space<vmem>>, %arg6: memref<2x1xf32, #tpu.memory_space<vmem>>, %arg7: memref<1x2x768xf32, #tpu.memory_space<vmem>>) attributes {dimension_semantics = [#tpu.dimension_semantics<parallel>, #tpu.dimension_semantics<parallel>], iteration_bounds = array<i64: 2, 1>, scalar_prefetch = 0 : i64, scratch_operands = 0 : i64, tpu.core_type = #tpu.core_type<tc>, window_params = [{transform_indices = @transform_0, window_bounds = array<i64: 1, 8, 768>}, {pipeline_mode = #tpu.pipeline_mode<synchronous>, transform_indices = @transform_1, window_bounds = array<i64: 32, 8>}, {pipeline_mode = #tpu.pipeline_mode<synchronous>, transform_indices = @transform_2, window_bounds = array<i64: 32, 1>}, {pipeline_mode = #tpu.pipeline_mode<synchronous>, transform_indices = @transform_3, window_bounds = array<i64: 2, 32>}, {pipeline_mode = #tpu.pipeline_mode<synchronous>, transform_indices = @transform_4, window_bounds = array<i64: 2, 1>}, {transform_indices = @transform_5, window_bounds = array<i64: 1, 2, 768>}]} {
    %c0 = arith.constant 0 : index
    %c0_0 = arith.constant 0 : index
    %c0_1 = arith.constant 0 : index
    %0 = vector.load %arg2[%c0, %c0_0, %c0_1] : memref<1x8x768xf32, #tpu.memory_space<vmem>>, vector<1x8x768xf32>
    %1 = vector.shape_cast %0 : vector<1x8x768xf32> to vector<8x768xf32>
    %2 = arith.truncf %1 : vector<8x768xf32> to vector<8x768xbf16>
    %c0_2 = arith.constant 0 : index
    %c0_3 = arith.constant 0 : index
    %3 = vector.load %arg3[%c0_2, %c0_3] : memref<32x8xf32, #tpu.memory_space<vmem>>, vector<32x8xf32>
    %4 = arith.truncf %3 : vector<32x8xf32> to vector<32x8xbf16>
    %cst = arith.constant dense<0.000000e+00> : vector<32x768xf32>
    %5 = tpu.matmul %4, %2, %cst {dimension_numbers = #tpu.dot_dimension_numbers<[1], [0], [0], [1], [0, 0, 1, 1], [], []>} : vector<32x8xbf16>, vector<8x768xbf16>, vector<32x768xf32> -> vector<32x768xf32>
    %c0_4 = arith.constant 0 : index
    %c0_5 = arith.constant 0 : index
    %6 = vector.load %arg4[%c0_4, %c0_5] : memref<32x1xf32, #tpu.memory_space<vmem>>, vector<32x1xf32>
    %7 = vector.broadcast %6 : vector<32x1xf32> to vector<32x768xf32>
    %8 = arith.addf %5, %7 : vector<32x768xf32>
    %9 = math.tanh %8 : vector<32x768xf32>
    %c0_6 = arith.constant 0 : index
    %c0_7 = arith.constant 0 : index
    %10 = vector.load %arg5[%c0_6, %c0_7] : memref<2x32xf32, #tpu.memory_space<vmem>>, vector<2x32xf32>
    %11 = arith.truncf %10 : vector<2x32xf32> to vector<2x32xbf16>
    %12 = arith.truncf %9 : vector<32x768xf32> to vector<32x768xbf16>
    %cst_8 = arith.constant dense<0.000000e+00> : vector<2x768xf32>
    %13 = tpu.matmul %11, %12, %cst_8 {dimension_numbers = #tpu.dot_dimension_numbers<[1], [0], [0], [1], [0, 0, 1, 1], [], []>} : vector<2x32xbf16>, vector<32x768xbf16>, vector<2x768xf32> -> vector<2x768xf32>
    %c0_9 = arith.constant 0 : index
    %c0_10 = arith.constant 0 : index
    %14 = vector.load %arg6[%c0_9, %c0_10] : memref<2x1xf32, #tpu.memory_space<vmem>>, vector<2x1xf32>
    %15 = vector.broadcast %14 : vector<2x1xf32> to vector<2x768xf32>
    %16 = arith.addf %13, %15 : vector<2x768xf32>
    %17 = math.tanh %16 : vector<2x768xf32>
    %c0_11 = arith.constant 0 : index
    %c0_12 = arith.constant 0 : index
    %c0_13 = arith.constant 0 : index
    %18 = vector.load %arg7[%c0_11, %c0_12, %c0_13] : memref<1x2x768xf32, #tpu.memory_space<vmem>>, vector<1x2x768xf32>
    %19 = vector.shape_cast %18 : vector<1x2x768xf32> to vector<2x768xf32>
    %20 = vector.shape_cast %17 : vector<2x768xf32> to vector<1x2x768xf32>
    tpu.vector_store %arg7[%c0_11, %c0_12, %c0_13], %20 {strides = array<i32>} : memref<1x2x768xf32, #tpu.memory_space<vmem>>, vector<1x2x768xf32>,
    return
  }
  func.func @transform_0(%arg0: i32, %arg1: i32) -> (i32, i32, i32) {
    %c0_i32 = arith.constant 0 : i32
    %c0_i32_0 = arith.constant 0 : i32
    return %arg0, %c0_i32, %arg1 : i32, i32, i32
  }
  func.func @transform_1(%arg0: i32, %arg1: i32) -> (i32, i32) {
    %c0_i32 = arith.constant 0 : i32
    %c0_i32_0 = arith.constant 0 : i32
    %c0_i32_1 = arith.constant 0 : i32
    return %c0_i32, %c0_i32_0 : i32, i32
  }
  func.func @transform_2(%arg0: i32, %arg1: i32) -> (i32, i32) {
    %c0_i32 = arith.constant 0 : i32
    %c0_i32_0 = arith.constant 0 : i32
    %c0_i32_1 = arith.constant 0 : i32
    return %c0_i32, %c0_i32_0 : i32, i32
  }
  func.func @transform_3(%arg0: i32, %arg1: i32) -> (i32, i32) {
    %c0_i32 = arith.constant 0 : i32
    %c0_i32_0 = arith.constant 0 : i32
    %c0_i32_1 = arith.constant 0 : i32
    return %c0_i32, %c0_i32_0 : i32, i32
  }
  func.func @transform_4(%arg0: i32, %arg1: i32) -> (i32, i32) {
    %c0_i32 = arith.constant 0 : i32
    %c0_i32_0 = arith.constant 0 : i32
    %c0_i32_1 = arith.constant 0 : i32
    return %c0_i32, %c0_i32_0 : i32, i32
  }
  func.func @transform_5(%arg0: i32, %arg1: i32) -> (i32, i32, i32) {
    %c0_i32 = arith.constant 0 : i32
    %c0_i32_0 = arith.constant 0 : i32
    return %arg0, %c0_i32, %arg1 : i32, i32, i32
  }
}

</mosaic_0001>

<bundles_post_ra>
// kernel: watermark_forward.3
= control target key start
LH: loop header
LB: loop body
LE: loop exit
PB: predicated region body
PF: predicated region fallthrough
CT: control target
= control target key end

     0   :  { %v70_v6 = vmov 0.0   ;;  %s139_s0 = inlined_call_operand.vmem [shape: f32[8,512], index: 0, kind: input, shape index: {}, may-alias: {0,2}]   ;;  %s140_s1 = inlined_call_operand.vmem [shape: f32[8,512], index: 1, kind: input, shape index: {}, may-alias: {1,3}]   ;;  %s141_s3 = inlined_call_operand.vmem [shape: f32[8,512], index: 3, kind: output, shape index: {1}, may-alias: {1,3}]   ;;  %s142_s2 = inlined_call_operand.vmem [shape: f32[8,512], index: 2, kind: output, shape index: {0}, may-alias: {0,2}]  }
   0x1   :  { %v13_v0 = vld [vmem:[%s139_s0] sm:$0xff]  ;;  %v14_v2 = vld [vmem:[%s139_s0 + $0x8] sm:$0xff]  ;;  %v15_v5 = vld [vmem:[%s139_s0 + $0x10] sm:$0xff] }
   0x2   :  { %v29_v1 = vld [vmem:[%s140_s1] sm:$0xff]  ;;  %vm17_vm0 = vcmp.ne.f32.partialorder %v13_v0, 0.0  ;;  %vm18_vm1 = vcmp.ne.f32.partialorder %v14_v2, 0.0  ;;  %v30_v4 = vld [vmem:[%s140_s1 + $0x8] sm:$0xff]  ;;  %vm19_vm2 = vcmp.ne.f32.partialorder %v15_v5, 0.0  ;;  %v31_v10 = vld [vmem:[%s140_s1 + $0x10] sm:$0xff] }
   0x3   :  { %v33_v3 = vadd.f32 1e-09, %v29_v1  ;;  %v65_v7 = vsel %vm17_vm0, 1.0, %v70_v6  ;;  %v66_v8 = vsel %vm18_vm1, 1.0, %v70_v6  ;;  %v34_v9 = vadd.f32 1e-09, %v30_v4 }
   0x4   :  { %v67_v12 = vsel %vm19_vm2, 1.0, %v70_v6  ;;  %v35_v13 = vadd.f32 1e-09, %v31_v10  ;;  %v16_v14 = vld [vmem:[%s139_s0 + $0x18] sm:$0xff] }
   0x5   :  { %v37_v11 = vmul.f32 %v65_v7, %v33_v3  ;;  %v32_v15 = vld [vmem:[%s140_s1 + $0x18] sm:$0xff]  ;;  %v38_v16 = vmul.f32 %v66_v8, %v34_v9  ;;  %vm20_vm3 = vcmp.ne.f32.partialorder %v16_v14, 0.0 }
   0x6   :  { %v36_v17 = vadd.f32 1e-09, %v32_v15  ;;  %v39_v19 = vmul.f32 %v67_v12, %v35_v13  ;;  %v68_v20 = vsel %vm20_vm3, 1.0, %v70_v6 }
   0x7   :  { %v41_v18 = vadd.f32 1e-07, %v37_v11  ;;  %v42_v21 = vadd.f32 1e-07, %v38_v16 }
   0x8   :  { %v40_v22 = vmul.f32 %v68_v20, %v36_v17  ;;  %v43_v24 = vadd.f32 1e-07, %v39_v19 }
   0x9   :  { %v45_v23 = vadd.f32 %v41_v18, %v13_v0  ;;  %53 = vst [vmem:[%s141_s3] sm:$0xff] %v41_v18  ;;  %v46_v25 = vadd.f32 %v42_v21, %v14_v2  ;;  %54 = vst [vmem:[%s141_s3 + $0x8] sm:$0xff] %v42_v21 }
   0xa   :  { %v44_v26 = vadd.f32 1e-07, %v40_v22  ;;  %v47_v27 = vadd.f32 %v43_v24, %v15_v5  ;;  %55 = vst [vmem:[%s141_s3 + $0x10] sm:$0xff] %v43_v24 }
   0xb   :  { %49 = vst [vmem:[%s142_s2] sm:$0xff] %v45_v23  ;;  %50 = vst [vmem:[%s142_s2 + $0x8] sm:$0xff] %v46_v25 }
   0xc   :  { %v48_v28 = vadd.f32 %v44_v26, %v16_v14  ;;  %56 = vst [vmem:[%s141_s3 + $0x18] sm:$0xff] %v44_v26  ;;  %51 = vst [vmem:[%s142_s2 + $0x10] sm:$0xff] %v47_v27 }
   0xe   :  { %52 = vst [vmem:[%s142_s2 + $0x18] sm:$0xff] %v48_v28 }

// kernel: watermark_forward.2
= control target key start
LH: loop header
LB: loop body
LE: loop exit
PB: predicated region body
PF: predicated region fallthrough
CT: control target
= control target key end

     0   :  { %s959_s18 = smov 0   ;;  %s961_s19 = smov 0   ;;  %s1079_s0 = inlined_call_operand.vmem [shape: f32[2,8,768], index: 0, kind: input, shape index: {}]   ;;  %s1080_s1 = inlined_call_operand.vmem [shape: f32[32,8], index: 1, kind: input, shape index: {}]   ;;  %s1081_s2 = inlined_call_operand.vmem [shape: f32[32,1], index: 2, kind: input, shape index: {}]   ;;  %s1082_s3 = inlined_call_operand.vmem [shape: f32[2,32], index: 3, kind: input, shape index: {}]   ;;  %s1083_s4 = inlined_call_operand.vmem [shape: f32[2,1], index: 4, kind: input, shape index: {}]   ;;  %s1084_s5 = inlined_call_operand.vmem [shape: f32[2,2,768], index: 5, kind: output, shape index: {}]  }
   0x1   :  { %s963_s20 = smov 0  }
   0x2 LB: > { %s27_s21 = sadd.s32 1, %s921_s19  ;;  %p795_p0 = scmp.ge.s32.totalorder %s925_s20, 1  ;;  %s925_s20 = sphi %s963_s20, %s15_s20   ;;  %s921_s19 = sphi %s961_s19, %s1086_s19   ;;  %s917_s18 = sphi %s959_s18, %s1085_s18  }
   0x3   : > { %p29_p1 = scmp.ge.s32.totalorder %s27_s21, 2  ;;  %p208_p2 = scmp.lt.s32.totalorder %s925_s20, 3 }
   0x5   : > { %s1088_s21 = smov (%p29_p1, %s27_s21), 0  ;;  %p209_p3 = pnand %p795_p0, %p208_p2 }
   0x6   : > { %p245_p4 = scmp.lt.s32.totalorder (!%p209_p3), %s917_s18, 1  ;;  %v927_v0 = vmov (!%p209_p3), 0   ;;  %v283_v1 = vld [vmem:[%s1081_s2] sm:$0xff] (!%p209_p3)  ;;  %v285_v2 = vld [vmem:[%s1081_s2 + $0x10] sm:$0xff] (!%p209_p3)  ;;  %v284_v3 = vld [vmem:[%s1081_s2 + $0x8] sm:$0xff] (!%p209_p3)  ;;  %vm314_vm0 = vcmask (!%p209_p3), 1043456  }
   0x7   : > { %212 = sbr.rel (%p209_p3) target bundleno = 512 (0x200), region = 40  ;;  %365 = vmatprep.mubr.bf16.mxu0 (!%p209_p3), %v927_v0  ;;  %418 = vmatprep.mubr.bf16.mxu1 (!%p209_p3), %v927_v0  ;;  %v286_v4 = vld [vmem:[%s1081_s2 + $0x18] sm:$0xff] (!%p209_p3)  ;;  %v277_v5 = vld [vmem:[%s1080_s1] sm:$0xff] (!%p209_p3)  ;;  %v278_v6 = vld [vmem:[%s1080_s1 + $0x8] sm:$0xff] (!%p209_p3)  ;;  %vm307_vm1 = vcmask (!%p209_p3), 64512   ;;  %vm536_vm2 = vcmask (!%p209_p3), 261120  }
   0x8   : > { %841 = vset.pattern.permute.xlu0 (!%p209_p3), %v927_v0  ;;  %842 = vset.pattern.permute.xlu1 (!%p209_p3), %v927_v0  ;;  %v530_v7 = vld [vmem:[%s1083_s4] sm:$0x3] (!%p209_p3)  ;;  %v281_v21 = vpack.c.bf16 (!%p209_p3), %v278_v6, %v277_v5  ;;  %v279_v24 = vld [vmem:[%s1080_s1 + $0x10] sm:$0xff] (!%p209_p3)  ;;  %v280_v25 = vld [vmem:[%s1080_s1 + $0x18] sm:$0xff] (!%p209_p3) }
   0x9   : > { %289 = vperm.xlu0 (!%p209_p3), %841, %v283_v1   ;;  %299 = vperm.xlu1 (!%p209_p3), %842, %v285_v2   ;;  %v282_v26 = vpack.c.bf16 (!%p209_p3), %v280_v25, %v279_v24 }
   0xd   : > { %294 = vperm.xlu0 (!%p209_p3), %841, %v284_v3   ;;  %304 = vperm.xlu1 (!%p209_p3), %842, %v286_v4  }
   0xe   : > { %s1090_s18 = smov (!%p245_p4, %s917_s18), 1 }
   0xf   : > { %s813_s26 = smul.u32 48, %s1090_s18 }
  0x10   : > { %s814_s25 = smul.u32 12, %s1090_s18 }
  0x11   : > { %s252_s8 = scalar_lea.vmem %s1079_s0, %s813_s26  ;;  %533 = vperm.xlu0 %841, %v530_v7  }
  0x12   : > { %v266_v8 = vld [vmem:[%s252_s8 + $0x8] sm:$0xff]  ;;  %v268_v9 = vld [vmem:[%s252_s8 + $0x18] sm:$0xff]  ;;  %v265_v10 = vld [vmem:[%s252_s8] sm:$0xff]  ;;  %s262_s28 = scalar_lea.vmem %s1084_s5, %s814_s25 }
  0x13   : > { %v272_v11 = vpack.c.bf16 %v266_v8, %v266_v8  ;;  %v274_v12 = vpack.c.bf16 %v268_v9, %v268_v9  ;;  %v271_v13 = vpack.c.bf16 %v265_v10, %v265_v10  ;;  %v267_v14 = vld [vmem:[%s252_s8 + $0x10] sm:$0xff]  ;;  %v270_v15 = vld [vmem:[%s252_s8 + $0x28] sm:$0xff]  ;;  %v269_v16 = vld [vmem:[%s252_s8 + $0x20] sm:$0xff] }
  0x14   : > { %v273_v17 = vpack.c.bf16 %v267_v14, %v267_v14  ;;  %v276_v18 = vpack.c.bf16 %v270_v15, %v270_v15  ;;  %v275_v19 = vpack.c.bf16 %v269_v16, %v269_v16 }
  0x15   : > { %798 = vmatprep.subr.msk.bf16.mxu0 %vm314_vm0, %v272_v11  ;;  %801 = vmatprep.subr.msk.bf16.mxu1 %vm314_vm0, %v274_v12  ;;  %v316_v20 = vsel %vm314_vm0, %v271_v13, 0 }
  0x16   : > { %334 = vmatpush1.bf16.msra.mxu0 %v316_v20  ;;  %v322_v22 = vsel %vm314_vm0, %v273_v17, 0  ;;  %v328_v23 = vsel %vm314_vm0, %v275_v19, 0 }
  0x17   : > { %387 = vmatpush1.bf16.msra.mxu1 %v322_v22  ;;  %804 = vmatprep.subr.msk.bf16.mxu0 %vm314_vm0, %v276_v18 }
  0x19   : > { %799 = vmatmul.mubr.msk.bf16.vlgmr.msra.gmra.mrb[0].mxu0 %vm307_vm1, %v281_v21 }
  0x1a   : > { %802 = vmatmul.mubr.msk.bf16.vlgmr.msra.gmra.mrb[0].mxu1 %vm307_vm1, %v281_v21  ;;  %440 = vmatpush1.bf16.msra.mxu0 %v328_v23 }
  0x1b   : > { %375 = vmatprep.mubr.bf16.mxu0 %v927_v0  ;;  %428 = vmatprep.mubr.bf16.mxu1 %v927_v0 }
  0x21   : > { %800 = vmatmul.mubr.msk.bf16.gmra.mrb[4].mxu0 %vm307_vm1, %v282_v26 }
  0x22   : > { %803 = vmatmul.mubr.msk.bf16.gmra.mrb[4].mxu1 %vm307_vm1, %v282_v26  ;;  %471 = vmatprep.mubr.bf16.mxu0 %v927_v0 }
  0x23   : > { %572 = vmatprep.mubr.bf16.mxu1 %v927_v0 }
  0x29   : > { %805 = vmatmul.mubr.msk.bf16.vlgmr.msra.gmra.mrb[8].mxu0 %vm307_vm1, %v281_v21 }
  0x2a   : > { %481 = vmatprep.mubr.bf16.mxu0 %v927_v0 }
  0x31   : > { %806 = vmatmul.mubr.msk.bf16.gmra.mrb[12].mxu0 %vm307_vm1, %v282_v26 }
  0x32   : > { %654 = vmatprep.mubr.bf16.mxu0 %v927_v0 }
  0x88   : > { %v290_v27 = vpop.permute.xlu0 %289  ;;  %v1032_v28 = vpop.permute.xlu1 %299 }
  0x8c   : > { %v1034_v29 = vpop.permute.xlu0 %294  ;;  %v1040_v47 = vpop.permute.xlu1 %304 }
  0xec   : > { %v367_v30 = vpop.f32.mrb[0].mxu0 }
  0xed   : > { %v368_v31 = vadd.f32 %v367_v30, %v290_v27  ;;  %v420_v32 = vpop.f32.mrb[0].mxu1  ;;  %v369_v33 = vpop.f32.mrb[1].mxu0 }
  0xee   : > { %v421_v34 = vadd.f32 %v420_v32, %v290_v27  ;;  %v370_v35 = vadd.f32 %v369_v33, %v290_v27  ;;  %v422_v36 = vpop.f32.mrb[1].mxu1  ;;  %v371_v37 = vpop.f32.mrb[2].mxu0 }
  0xef   : > { %843 = vtanh.f32 %v368_v31  ;;  %v423_v38 = vadd.f32 %v422_v36, %v290_v27  ;;  %v372_v39 = vadd.f32 %v371_v37, %v1034_v29  ;;  %v424_v40 = vpop.f32.mrb[2].mxu1  ;;  %v373_v41 = vpop.f32.mrb[3].mxu0  ;;  %v516_v36 = vld [vmem:[%s1082_s3] sm:$0x3] }
  0xf0   : > { %845 = vtanh.f32 %v421_v34  ;;  %v425_v42 = vadd.f32 %v424_v40, %v1034_v29  ;;  %v426_v43 = vpop.f32.mrb[3].mxu1  ;;  %v374_v44 = vadd.f32 %v373_v41, %v1034_v29 }
  0xf1   : > { %847 = vtanh.f32 %v370_v35  ;;  %v427_v45 = vadd.f32 %v426_v43, %v1034_v29  ;;  %v517_v43 = vpack.c.bf16 %v516_v36, %v516_v36 }
  0xf2   : > { %849 = vtanh.f32 %v423_v38 }
  0xf3   : > { %851 = vtanh.f32 %v372_v39 }
  0xf4   : > { %853 = vtanh.f32 %v425_v42  ;;  %v377_v46 = vpop.f32.mrb[4].mxu0 }
  0xf5   : > { %855 = vtanh.f32 %v374_v44  ;;  %v378_v48 = vadd.f32 %v377_v46, %v1032_v28  ;;  %v430_v49 = vpop.f32.mrb[4].mxu1  ;;  %v379_v50 = vpop.f32.mrb[5].mxu0 }
  0xf6   : > { %857 = vtanh.f32 %v427_v45  ;;  %v431_v51 = vadd.f32 %v430_v49, %v1032_v28  ;;  %v380_v52 = vadd.f32 %v379_v50, %v1032_v28  ;;  %v432_v53 = vpop.f32.mrb[5].mxu1  ;;  %v381_v54 = vpop.f32.mrb[6].mxu0 }
  0xf7   : > { %859 = vtanh.f32 %v378_v48  ;;  %v433_v55 = vadd.f32 %v432_v53, %v1032_v28  ;;  %v382_v56 = vadd.f32 %v381_v54, %v1040_v47  ;;  %v434_v57 = vpop.f32.mrb[6].mxu1  ;;  %v383_v58 = vpop.f32.mrb[7].mxu0 }
  0xf8   : > { %861 = vtanh.f32 %v431_v51  ;;  %v435_v59 = vadd.f32 %v434_v57, %v1040_v47  ;;  %v436_v60 = vpop.f32.mrb[7].mxu1  ;;  %v384_v62 = vadd.f32 %v383_v58, %v1040_v47  ;;  %v534_v54 = vpop.permute.xlu0 %533 }
  0xf9   : > { %v844_v61 = vpop.eup %843  ;;  %863 = vtanh.f32 %v380_v52  ;;  %v437_v1 = vadd.f32 %v436_v60, %v1040_v47 }
  0xfa   : > { %v1049_v63 = vpop.eup %845  ;;  %865 = vtanh.f32 %v433_v55 }
  0xfb   : > { %v848_v2 = vpop.eup %847  ;;  %867 = vtanh.f32 %v382_v56 }
  0xfc   : > { %v850_v3 = vpop.eup %849  ;;  %869 = vtanh.f32 %v435_v59  ;;  %v473_v4 = vpop.f32.mrb[8].mxu0 }
  0xfd   : > { %v852_v5 = vpop.eup %851  ;;  %871 = vtanh.f32 %v384_v62  ;;  %v474_v6 = vadd.f32 %v473_v4, %v290_v27  ;;  %v475_v7 = vpop.f32.mrb[9].mxu0  ;;  %v928_v4 = vmov 1983009808  }
  0xfe   : > { %v854_v8 = vpop.eup %853  ;;  %873 = vtanh.f32 %v437_v1  ;;  %v476_v9 = vadd.f32 %v475_v7, %v290_v27  ;;  %v477_v10 = vpop.f32.mrb[10].mxu0  ;;  %v518_v11 = vpack.c.bf16 %v852_v5, %v844_v61  ;;  %v678_v5 = vunpack.c.l.s4 %v928_v4 }
  0xff   : > { %v856_v12 = vpop.eup %855  ;;  %875 = vtanh.f32 %v474_v6  ;;  %v478_v13 = vadd.f32 %v477_v10, %v1034_v29  ;;  %v479_v14 = vpop.f32.mrb[11].mxu0  ;;  %v520_v15 = vpack.c.bf16 %v854_v8, %v1049_v63  ;;  %v680_v6 = vlaneseq }
 0x100   : > { %v858_v16 = vpop.eup %857  ;;  %877 = vtanh.f32 %v476_v9  ;;  %v480_v17 = vadd.f32 %v479_v14, %v1034_v29  ;;  %v519_v18 = vpack.c.bf16 %v856_v12, %v848_v2 }
 0x101   : > { %v860_v19 = vpop.eup %859  ;;  %879 = vtanh.f32 %v478_v13  ;;  %v521_v20 = vpack.c.bf16 %v858_v16, %v850_v3  ;;  %v681_v16 = vshrl.u32 %v680_v6, 7 }
 0x102   : > { %v862_v21 = vpop.eup %861  ;;  %881 = vtanh.f32 %v480_v17  ;;  %540 = vmatprep.subr.bf16.mxu1 %v519_v18 }
 0x103   : > { %v864_v22 = vpop.eup %863  ;;  %541 = vmatpush1.bf16.msra.mxu1 %v518_v11 }
 0x104   : > { %v866_v23 = vpop.eup %865  ;;  %v483_v24 = vpop.f32.mrb[12].mxu0 }
 0x105   : > { %v868_v25 = vpop.eup %867  ;;  %v484_v26 = vadd.f32 %v483_v24, %v1032_v28  ;;  %v485_v27 = vpop.f32.mrb[13].mxu0 }
 0x106   : > { %v870_v30 = vpop.eup %869  ;;  %v486_v31 = vadd.f32 %v485_v27, %v1032_v28  ;;  %v487_v32 = vpop.f32.mrb[14].mxu0  ;;  %v524_v29 = vpack.c.bf16 %v868_v25, %v860_v19 }
 0x107   : > { %v872_v33 = vpop.eup %871  ;;  %883 = vtanh.f32 %v484_v26  ;;  %v488_v34 = vadd.f32 %v487_v32, %v1040_v47  ;;  %v489_v35 = vpop.f32.mrb[15].mxu0  ;;  %v526_v37 = vpack.c.bf16 %v870_v30, %v862_v21 }
 0x108   : > { %v874_v38 = vpop.eup %873  ;;  %885 = vtanh.f32 %v486_v31  ;;  %v490_v39 = vadd.f32 %v489_v35, %v1040_v47  ;;  %v525_v40 = vpack.c.bf16 %v872_v33, %v864_v22 }
 0x109   : > { %v876_v41 = vpop.eup %875  ;;  %887 = vtanh.f32 %v488_v34  ;;  %v527_v28 = vpack.c.bf16 %v874_v38, %v866_v23 }
 0x10a   : > { %v878_v42 = vpop.eup %877  ;;  %889 = vtanh.f32 %v490_v39  ;;  %542 = vmatprep.subr.bf16.mxu1 %v525_v40 }
 0x10b   : > { %v880_v44 = vpop.eup %879  ;;  %543 = vmatpush1.bf16.msra.mxu1 %v524_v29 }
 0x10c   : > { %v882_v45 = vpop.eup %881  ;;  %581 = vmatprep.subr.bf16.mxu1 %v521_v20  ;;  %v522_v46 = vpack.c.bf16 %v880_v44, %v876_v41 }
 0x10d   : > { %v523_v48 = vpack.c.bf16 %v882_v45, %v878_v42 }
 0x10e   : > { %807 = vmatmul.mubr.msk.bf16.vlgmr.msra.gmra.mrb[8].mxu1 %vm536_vm2, %v517_v43 }
 0x10f   : > { %582 = vmatpush1.bf16.msra.mxu1 %v520_v15  ;;  %622 = vmatprep.subr.bf16.mxu0 %v523_v48  ;;  %v679_v15 = vunpack.c.0.s8 %v678_v5 }
 0x110   : > { %583 = vmatprep.subr.bf16.mxu1 %v527_v28  ;;  %623 = vmatpush1.bf16.msra.mxu0 %v522_v46 }
 0x111   : > { %v884_v47 = vpop.eup %883  ;;  %613 = vmatprep.mubr.bf16.mxu1 %v927_v0  ;;  %v682_v18 = vsub.s32 %v679_v15, %v681_v16 }
 0x112   : > { %v886_v49 = vpop.eup %885 }
 0x113   : > { %v888_v50 = vpop.eup %887  ;;  %584 = vmatpush1.bf16.msra.mxu1 %v526_v37 }
 0x114   : > { %v890_v51 = vpop.eup %889  ;;  %v528_v52 = vpack.c.bf16 %v888_v50, %v884_v47 }
 0x115   : > { %v529_v53 = vpack.c.bf16 %v890_v51, %v886_v49 }
 0x116   : > { %808 = vmatmul.mubr.msk.bf16.vlgmr.msra.gmra.mrb[12].mxu1 %vm536_vm2, %v517_v43 }
 0x117   : > { %624 = vmatprep.subr.bf16.mxu0 %v529_v53 }
 0x118   : > { %625 = vmatpush1.bf16.msra.mxu0 %v528_v52 }
 0x11b   : > { %809 = vmatmul.mubr.msk.bf16.vlgmr.msra.gmra.mrb[16].mxu0 %vm536_vm2, %v517_v43 }
 0x1e1   : > { %v574_v55 = vpop.f32.mrb[8].mxu1 }
 0x1e2   : > { %v575_v56 = vadd.f32 %v574_v55, %v534_v54  ;;  %v576_v57 = vpop.f32.mrb[9].mxu1 }
 0x1e3   : > { %v577_v58 = vadd.f32 %v576_v57, %v534_v54  ;;  %v578_v59 = vpop.f32.mrb[10].mxu1 }
 0x1e4   : > { %891 = vtanh.f32 %v575_v56  ;;  %v579_v0 = vpop.f32.mrb[11].mxu1 }
 0x1e5   : > { %893 = vtanh.f32 %v577_v58 }
 0x1e9   : > { %v615_v60 = vpop.f32.mrb[12].mxu1 }
 0x1ea   : > { %v616_v61 = vadd.f32 %v615_v60, %v534_v54  ;;  %v617_v62 = vpop.f32.mrb[13].mxu1 }
 0x1eb   : > { %v618_v63 = vadd.f32 %v617_v62, %v534_v54  ;;  %v619_v1 = vpop.f32.mrb[14].mxu1 }
 0x1ec   : > { %895 = vtanh.f32 %v616_v61  ;;  %v620_v2 = vpop.f32.mrb[15].mxu1 }
 0x1ed   : > { %897 = vtanh.f32 %v618_v63 }
 0x1ee   : > { %v892_v3 = vpop.eup %891  ;;  %v656_v7 = vpop.f32.mrb[16].mxu0 }
 0x1ef   : > { %v894_v8 = vpop.eup %893  ;;  %v657_v9 = vadd.f32 %v656_v7, %v534_v54  ;;  %v658_v10 = vpop.f32.mrb[17].mxu0 }
 0x1f0   : > { %v675_v11 = vcombine.low %v892_v3, %v894_v8  ;;  %v659_v12 = vadd.f32 %v658_v10, %v534_v54  ;;  %v660_v13 = vpop.f32.mrb[18].mxu0 }
 0x1f1   : > { %899 = vtanh.f32 %v657_v9  ;;  %v661_v14 = vpop.f32.mrb[19].mxu0 }
 0x1f2   : > { %901 = vtanh.f32 %v659_v12  ;;  %v683_v21 = vrot.slane %v675_v11, %v682_v18 }
 0x1f6   : > { %v896_v17 = vpop.eup %895 }
 0x1f7   : > { %v898_v19 = vpop.eup %897 }
 0x1f8   : > { %v676_v20 = vcombine.low %v896_v17, %v898_v19 }
 0x1fa   : > { %v690_v22 = vrot.slane %v676_v20, %v682_v18 }
 0x1fb   : > { %v900_v23 = vpop.eup %899 }
 0x1fc   : > { %v902_v24 = vpop.eup %901  ;;  %v691_v25 = vcombine.low %v683_v21, %v690_v22 }
 0x1fd   : > { %v692_v26 = vcombine.low %v900_v23, %v902_v24 }
 0x1fe   : > { %702 = vst [vmem:[%s262_s28] sm:$0xff] %v691_v25 }
 0x1ff   : > { %810 = vst.sshfl [vmem:[%s262_s28 + $0x8] sm:$0x33 pattern:$0x76325410] %v692_v26 }
 0x200 PF: > { %s15_s20 = sadd.s32 1, %s925_s20   ;;  %s1085_s18 = smov %s921_s19 }
 0x201   : > { %p12_p5 = scmp.ge.s32.totalorder %s15_s20, 4   ;;  %s1086_s19 = smov %s1088_s21 }
 0x203   :  { %14 = sbr.rel (!%p12_p5) target bundleno = 2 (0x2), region = 70 }

</bundles_post_ra>
